<compile_context>
chip_gen: v6e
topology: v6e:2x2x1
jax: 0.10.0
libtpu: 0.0.40
codegen_flags: <defaults>
</compile_context>

<pallas_src>
import functools

import jax
import jax.numpy as jnp
from jax.experimental import pallas as pl
from jax.experimental.pallas import tpu as pltpu

_LANE = 128


# --------------------------------------------------------------------------- #
# Kernels
# --------------------------------------------------------------------------- #
def _ln_kernel_wide(x_ref, alpha_ref, bias_ref, o_ref, *, features, eps):
    """Layer-norm over the full last dim.  x_ref: (block_rows, F)."""
    x = x_ref[...].astype(jnp.float32)                       # (br, F)
    mean = jnp.mean(x, axis=-1, keepdims=True)               # (br, 1)
    diff = x - mean
    # PyTorch x.std(dim=-1) is the *unbiased* std (Bessel, N-1).  Two-pass
    # (diff-based) variance is kept for numerical accuracy.
    denom = jnp.float32(1.0 / max(features - 1, 1))
    var = jnp.sum(diff * diff, axis=-1, keepdims=True) * denom
    inv = pl.reciprocal(jnp.sqrt(var) + jnp.float32(eps), approx=False)
    # Epilogue: out = x*scale + shift; `diff` is dead here (lower vreg pressure).
    scale = alpha_ref[...].astype(jnp.float32) * inv          # (br, F)
    shift = bias_ref[...].astype(jnp.float32) - mean * scale  # (br, F)
    o_ref[...] = (x * scale + shift).astype(o_ref.dtype)


def _ln_kernel_folded(x_ref, alpha_ref, bias_ref, seg_ref, o_ref, *,
                      features, eps):
    """Narrow-feature layer-norm with G = lanes//features rows folded into the
    lane dim.  Per-segment sums are computed via a block-diagonal matmul so the
    output stays lane-dense.  x_ref: (block_rows, G*F)."""
    x = x_ref[...].astype(jnp.float32)                        # (br, L)
    seg = seg_ref[...]                                        # (L, L) block-diag ones
    sums = jnp.dot(x, seg, preferred_element_type=jnp.float32)
    mean = sums * jnp.float32(1.0 / features)                 # per-segment mean, per lane
    diff = x - mean
    denom = jnp.float32(1.0 / max(features - 1, 1))
    var = jnp.dot(diff * diff, seg, preferred_element_type=jnp.float32) * denom
    inv = pl.reciprocal(jnp.sqrt(var) + jnp.float32(eps), approx=False)
    scale = alpha_ref[...].astype(jnp.float32) * inv
    shift = bias_ref[...].astype(jnp.float32) - mean * scale
    o_ref[...] = (x * scale + shift).astype(o_ref.dtype)


# --------------------------------------------------------------------------- #
# Tiling / hardware helpers
# --------------------------------------------------------------------------- #
def _vmem_config():
    """(data budget, compiler vmem limit), generation-aware with a safe fallback."""
    try:
        cap = int(pltpu.get_tpu_info().vmem_capacity_bytes)
    except Exception:
        cap = 64 << 20  # conservative: assume v7x-sized VMEM
    # v7x (64 MiB):  limit 56 MiB, budget 48 MiB.
    # v5e/v6e (128): limit 64 MiB, budget 48 MiB.
    limit = min(max(cap - (8 << 20), 16 << 20), 64 << 20)
    budget = min(max(limit - (8 << 20), 8 << 20), 48 << 20)
    return budget, limit


def _dimension_semantics():
    """Shard the row axis across both TensorCores on v7x."""
    try:
        kind = jax.devices()[0].device_kind.lower()
    except Exception:
        kind = ""
    if "v7" in kind and hasattr(pltpu, "CORE_PARALLEL"):
        return (pltpu.CORE_PARALLEL,)
    return (pltpu.PARALLEL,)


def _choose_block_rows(rows, lanes, itemsize, budget_bytes, requested=None):
    """Sublane-aligned row-block size.

    Per-step traffic target: ~8 MiB of in+out HBM bytes (never < 512 rows).
    VMEM model per row: double-buffered in + out tiles at the input dtype
    (4*lanes*itemsize) plus ~4 full-tile f32 kernel temporaries (16*lanes).
    """
    align = 8 * max(1, 4 // max(1, itemsize))  # f32->8, bf16->16, i8->32 rows
    if requested is None:
        target = max(512, (8 << 20) // max(1, 2 * lanes * itemsize))
    else:
        target = requested
    bytes_per_row = lanes * (4 * itemsize + 16)
    max_by_vmem = max(align, budget_bytes // max(1, bytes_per_row))
    rows_padded = ((rows + align - 1) // align) * align
    br = min(target, max_by_vmem, rows_padded)
    br = max(align, (br // align) * align)
    return br


# --------------------------------------------------------------------------- #
# pallas_call wrappers
# --------------------------------------------------------------------------- #
def _call_wide(x2d, alpha2d, bias2d, *, features, eps, block_rows=None):
    rows, lanes = x2d.shape
    itemsize = jnp.dtype(x2d.dtype).itemsize
    budget, limit = _vmem_config()
    br = _choose_block_rows(rows, lanes, itemsize, budget, block_rows)
    grid = (pl.cdiv(rows, br),)
    kernel = functools.partial(_ln_kernel_wide, features=features, eps=eps)
    return pl.pallas_call(
        kernel,
        out_shape=jax.ShapeDtypeStruct((rows, lanes), x2d.dtype),
        grid_spec=pltpu.PrefetchScalarGridSpec(
            num_scalar_prefetch=0,
            grid=grid,
            in_specs=[
                pl.BlockSpec((br, lanes), lambda i: (i, 0)),
                pl.BlockSpec((1, lanes), lambda i: (0, 0)),  # alpha resident
                pl.BlockSpec((1, lanes), lambda i: (0, 0)),  # bias  resident
            ],
            out_specs=pl.BlockSpec((br, lanes), lambda i: (i, 0)),
        ),
        compiler_params=pltpu.CompilerParams(
            dimension_semantics=_dimension_semantics(),
            vmem_limit_bytes=limit,
        ),
    )(x2d, alpha2d, bias2d)


def _call_folded(xf, alpha_f, bias_f, seg, *, features, eps, block_rows=None):
    rows, lanes = xf.shape
    itemsize = jnp.dtype(xf.dtype).itemsize
    budget, limit = _vmem_config()
    br = _choose_block_rows(rows, lanes, itemsize, budget, block_rows)
    grid = (pl.cdiv(rows, br),)
    kernel = functools.partial(_ln_kernel_folded, features=features, eps=eps)
    return pl.pallas_call(
        kernel,
        out_shape=jax.ShapeDtypeStruct((rows, lanes), xf.dtype),
        grid_spec=pltpu.PrefetchScalarGridSpec(
            num_scalar_prefetch=0,
            grid=grid,
            in_specs=[
                pl.BlockSpec((br, lanes), lambda i: (i, 0)),
                pl.BlockSpec((1, lanes), lambda i: (0, 0)),      # alpha (tiled)
                pl.BlockSpec((1, lanes), lambda i: (0, 0)),      # bias  (tiled)
                pl.BlockSpec((lanes, lanes), lambda i: (0, 0)),  # segment matrix
            ],
            out_specs=pl.BlockSpec((br, lanes), lambda i: (i, 0)),
        ),
        compiler_params=pltpu.CompilerParams(
            dimension_semantics=_dimension_semantics(),
            vmem_limit_bytes=limit,
        ),
    )(xf, alpha_f, bias_f, seg)


def pallas_layernorm(x2d, alpha, bias, *, eps=1e-6):
    """x2d: (rows, F); alpha/bias: (F,).  Matches layernormalization.forward."""
    rows, features = x2d.shape
    if features < _LANE and _LANE % features == 0 and rows % (_LANE // features) == 0:
        # Narrow features: fold G rows into the lane dim so stores stay lane-dense.
        groups = _LANE // features
        xf = x2d.reshape(rows // groups, _LANE)
        alpha_f = jnp.tile(alpha.reshape(1, features), (1, groups))
        bias_f = jnp.tile(bias.reshape(1, features), (1, groups))
        idx = jnp.arange(_LANE) // features
        seg = (idx[:, None] == idx[None, :]).astype(jnp.float32)
        yf = _call_folded(xf, alpha_f, bias_f, seg, features=features, eps=eps)
        return yf.reshape(rows, features)
    return _call_wide(
        x2d,
        alpha.reshape(1, features),
        bias.reshape(1, features),
        features=features,
        eps=eps,
    )


# --------------------------------------------------------------------------- #
# Encoder module
# --------------------------------------------------------------------------- #
class EncoderPallas:
    """JAX/Pallas port of Encoder(features, layers) with an empty layer list."""

    def __init__(self, features: int, eps: float = 1e-6):
        self.features = features
        self.eps = eps
        # Deterministic parameter init matching layernormalization.__init__.
        self.alpha = jnp.ones((features,), dtype=jnp.float32)
        self.bias = jnp.zeros((features,), dtype=jnp.float32)
        # TODO(synk): generic `layers: nn.ModuleList` contents are unspecified;
        # Encoder is instantiated with an empty layer list, so forward == norm(x).
        self.layers = ()

    def __call__(self, x, mask=None):
        # x: (batch, seq, features)
        for layer in self.layers:
            x = layer(x, mask)
        b, s, f = x.shape
        y2d = pallas_layernorm(x.reshape(b * s, f), self.alpha, self.bias,
                               eps=self.eps)
        return y2d.reshape(b, s, f)


# --------------------------------------------------------------------------- #
# Self-test
# --------------------------------------------------------------------------- #
def _reference_norm(x, alpha, bias, eps):
    features = x.shape[-1]
    mean = jnp.mean(x, axis=-1, keepdims=True)
    std = jnp.sqrt(jnp.sum((x - mean) ** 2, axis=-1, keepdims=True)
                   / (features - 1))
    return alpha * (x - mean) / (std + eps) + bias


if __name__ == "__main__":
    key = jax.random.PRNGKey(0)
    k1, k2 = jax.random.split(key)

    # Case 1: narrow features (F=32) -> lane-folded kernel path.
    batch, seq, features = 2, 8, 32
    x = jax.random.normal(k1, (batch, seq, features), dtype=jnp.float32)
    mask = jnp.ones((batch, 1, seq, seq), dtype=jnp.float32)  # unused (empty layers)
    enc = EncoderPallas(features)
    out = jax.block_until_ready(enc(x, mask))
    ref = _reference_norm(x, enc.alpha, enc.bias, enc.eps)
    assert jnp.allclose(out, ref, atol=1e-5, rtol=1e-5), "folded-path mismatch"

    # Case 2: lane-wide features (F=128) -> plain streaming kernel path.
    features2 = 128
    x2 = jax.random.normal(k2, (batch, seq, features2), dtype=jnp.float32)
    enc2 = EncoderPallas(features2)
    out2 = jax.block_until_ready(enc2(x2, mask))
    ref2 = _reference_norm(x2, enc2.alpha, enc2.bias, enc2.eps)
    assert jnp.allclose(out2, ref2, atol=1e-5, rtol=1e-5), "wide-path mismatch"

    print("KERNEL_OK")
</pallas_src>

<mosaic_0001>
module attributes {stable_mosaic.version = 11 : i64} {
  func.func @_ln_kernel_folded(%arg0: i32, %arg1: memref<8x128xf32, #tpu.memory_space<vmem>>, %arg2: memref<1x128xf32, #tpu.memory_space<vmem>>, %arg3: memref<1x128xf32, #tpu.memory_space<vmem>>, %arg4: memref<128x128xf32, #tpu.memory_space<vmem>>, %arg5: memref<8x128xf32, #tpu.memory_space<vmem>>) attributes {dimension_semantics = [#tpu.dimension_semantics<parallel>], iteration_bounds = array<i64: 1>, scalar_prefetch = 0 : i64, scratch_operands = 0 : i64, tpu.core_type = #tpu.core_type<tc>, window_params = [{transform_indices = @transform_0, window_bounds = array<i64: 8, 128>}, {pipeline_mode = #tpu.pipeline_mode<synchronous>, transform_indices = @transform_1, window_bounds = array<i64: 1, 128>}, {pipeline_mode = #tpu.pipeline_mode<synchronous>, transform_indices = @transform_2, window_bounds = array<i64: 1, 128>}, {pipeline_mode = #tpu.pipeline_mode<synchronous>, transform_indices = @transform_3, window_bounds = array<i64: 128, 128>}, {transform_indices = @transform_4, window_bounds = array<i64: 8, 128>}]} {
    %c0 = arith.constant 0 : index
    %c0_0 = arith.constant 0 : index
    %0 = vector.load %arg1[%c0, %c0_0] : memref<8x128xf32, #tpu.memory_space<vmem>>, vector<8x128xf32>
    %c0_1 = arith.constant 0 : index
    %c0_2 = arith.constant 0 : index
    %1 = vector.load %arg4[%c0_1, %c0_2] : memref<128x128xf32, #tpu.memory_space<vmem>>, vector<128x128xf32>
    %cst = arith.constant dense<0.000000e+00> : vector<8x128xf32>
    %2 = tpu.matmul %0, %1, %cst {dimension_numbers = #tpu.dot_dimension_numbers<[1], [0], [0], [1], [0, 0, 1, 1], [], []>} : vector<8x128xf32>, vector<128x128xf32>, vector<8x128xf32> -> vector<8x128xf32>
    %cst_3 = arith.constant 3.125000e-02 : f32
    %3 = vector.broadcast %cst_3 : f32 to vector<8x128xf32>
    %4 = arith.mulf %2, %3 : vector<8x128xf32>
    %5 = arith.subf %0, %4 : vector<8x128xf32>
    %6 = arith.mulf %5, %5 : vector<8x128xf32>
    %cst_4 = arith.constant dense<0.000000e+00> : vector<8x128xf32>
    %7 = tpu.matmul %6, %1, %cst_4 {dimension_numbers = #tpu.dot_dimension_numbers<[1], [0], [0], [1], [0, 0, 1, 1], [], []>} : vector<8x128xf32>, vector<128x128xf32>, vector<8x128xf32> -> vector<8x128xf32>
    %cst_5 = arith.constant 0.0322580636 : f32
    %8 = vector.broadcast %cst_5 : f32 to vector<8x128xf32>
    %9 = arith.mulf %7, %8 : vector<8x128xf32>
    %10 = math.sqrt %9 : vector<8x128xf32>
    %cst_6 = arith.constant 9.99999997E-7 : f32
    %11 = vector.broadcast %cst_6 : f32 to vector<8x128xf32>
    %12 = arith.addf %10, %11 : vector<8x128xf32>
    %13 = tpu.reciprocal %12 : vector<8x128xf32> -> vector<8x128xf32>
    %c0_7 = arith.constant 0 : index
    %c0_8 = arith.constant 0 : index
    %14 = vector.load %arg2[%c0_7, %c0_8] : memref<1x128xf32, #tpu.memory_space<vmem>>, vector<1x128xf32>
    %15 = vector.broadcast %14 : vector<1x128xf32> to vector<8x128xf32>
    %16 = arith.mulf %15, %13 : vector<8x128xf32>
    %c0_9 = arith.constant 0 : index
    %c0_10 = arith.constant 0 : index
    %17 = vector.load %arg3[%c0_9, %c0_10] : memref<1x128xf32, #tpu.memory_space<vmem>>, vector<1x128xf32>
    %18 = arith.mulf %4, %16 : vector<8x128xf32>
    %19 = vector.broadcast %17 : vector<1x128xf32> to vector<8x128xf32>
    %20 = arith.subf %19, %18 : vector<8x128xf32>
    %21 = arith.mulf %0, %16 : vector<8x128xf32>
    %22 = arith.addf %21, %20 : vector<8x128xf32>
    %c0_11 = arith.constant 0 : index
    %c0_12 = arith.constant 0 : index
    %23 = vector.load %arg5[%c0_11, %c0_12] : memref<8x128xf32, #tpu.memory_space<vmem>>, vector<8x128xf32>
    tpu.vector_store %arg5[%c0_11, %c0_12], %22 {strides = array<i32>} : memref<8x128xf32, #tpu.memory_space<vmem>>, vector<8x128xf32>,
    return
  }
  func.func @transform_0(%arg0: i32) -> (i32, i32) {
    %c0_i32 = arith.constant 0 : i32
    %c0_i32_0 = arith.constant 0 : i32
    return %arg0, %c0_i32 : i32, i32
  }
  func.func @transform_1(%arg0: i32) -> (i32, i32) {
    %c0_i32 = arith.constant 0 : i32
    %c0_i32_0 = arith.constant 0 : i32
    %c0_i32_1 = arith.constant 0 : i32
    return %c0_i32, %c0_i32_0 : i32, i32
  }
  func.func @transform_2(%arg0: i32) -> (i32, i32) {
    %c0_i32 = arith.constant 0 : i32
    %c0_i32_0 = arith.constant 0 : i32
    %c0_i32_1 = arith.constant 0 : i32
    return %c0_i32, %c0_i32_0 : i32, i32
  }
  func.func @transform_3(%arg0: i32) -> (i32, i32) {
    %c0_i32 = arith.constant 0 : i32
    %c0_i32_0 = arith.constant 0 : i32
    %c0_i32_1 = arith.constant 0 : i32
    return %c0_i32, %c0_i32_0 : i32, i32
  }
  func.func @transform_4(%arg0: i32) -> (i32, i32) {
    %c0_i32 = arith.constant 0 : i32
    %c0_i32_0 = arith.constant 0 : i32
    return %arg0, %c0_i32 : i32, i32
  }
}

</mosaic_0001>

<bundles_post_ra>
// kernel: tpu_custom_call.1
= control target key start
LH: loop header
LB: loop body
LE: loop exit
PB: predicated region body
PF: predicated region fallthrough
CT: control target
= control target key end

     0   :  { %9 = vsyncpa [#allocation3], 0  ;;  %s528_s0 = inlined_call_operand.hbm [shape: f32[4,128], index: 0, kind: input, shape index: {}]   ;;  %s529_s1 = inlined_call_operand.vmem [shape: f32[1,128], index: 1, kind: input, shape index: {}]   ;;  %s530_s2 = inlined_call_operand.vmem [shape: f32[1,128], index: 2, kind: input, shape index: {}]   ;;  %s531_s3 = inlined_call_operand.hbm [shape: f32[128,128], index: 3, kind: input, shape index: {}]   ;;  %s532_s4 = inlined_call_operand.hbm [shape: f32[4,128], index: 4, kind: output, shape index: {}]  }
   0x1   :  { %10 = vsyncpa [#allocation6], 0 }
   0x2   :  { %11 = vsyncpa [#allocation4], 0 }
   0x3   :  { %16 = vsyncadd [#allocation3], 64  ;;  %s439_s15 = smov [#allocation2]  }
   0x4   :  { %s17_s16 = sshll.u32 %s439_s15, 4  ;;  %s18_s16 = int_to_ptr.vmem [resolvable:$true] %s17_s16 }
   0x5   :  { %s381_s17 = scalar_lea.vmem %s18_s16, 64  ;;  %s385_s18 = scalar_lea.vmem %s18_s16, 128 }
   0x6   :  { %p382_p0 = scmp.ne.s32.totalorder %s18_s16, %s381_s17  ;;  %p386_p1 = scmp.lt.s32.totalorder %s18_s16, %s18_s16 }
   0x7   :  { %p387_p2 = scmp.lt.s32.totalorder %s385_s18, %s381_s17 }
   0x9   :  { %p388_p3 = por %p387_p2, %p386_p1 }
   0xb   :  { %p389_p4 = pnand %p388_p3, %p382_p0 }
   0xd   :  { %392 = shalt.err (!%p389_p4)
}
   0xe   :  { %s440_s19 = smov 64   ;;  %s441_s20 = smov 4  }
   0xf   :  { %23 = dma.hbm_to_vmem [thread:$0]  %s528_s0, 64, %s18_s16, [#allocation3], %s440_s19, %s440_s19, %s441_s20  }
  0x10   :  { %s442_s23 = smov [#allocation5]  }
  0x11   :  { %s33_s24 = sshll.u32 %s442_s23, 4  ;;  %s34_s24 = int_to_ptr.vmem [resolvable:$true] %s33_s24 }
  0x12   :  { %s401_s25 = scalar_lea.vmem %s34_s24, 2048  ;;  %p406_p6 = scmp.lt.s32.totalorder %s34_s24, %s34_s24 }
  0x13   :  { %p402_p5 = scmp.ne.s32.totalorder %s34_s24, %s401_s25  ;;  %p407_p7 = scmp.lt.s32.totalorder %s401_s25, %s401_s25 }
  0x15   :  { %p408_p8 = por %p407_p7, %p406_p6 }
  0x17   :  { %p409_p9 = pnand %p408_p8, %p402_p5 }
  0x19   :  { %412 = shalt.err (!%p409_p9)
}
  0x1a   :  { %s443_s26 = smov 128   ;;  %s444_s27 = smov 8  }
  0x1b   :  { %39 = dma.hbm_to_vmem [thread:$0]  %s531_s3, 2048, %s34_s24, [#allocation6], %s443_s26, %s443_s26, %s444_s27  }
  0x1c   :  { %433 = dma.done.wait [#allocation3], 128  }
  0x1d   :  { %434 = vsyncadd [#allocation3], 4294967168 }
  0x1e   :  { %435 = dma.done.wait [#allocation6], 2048  }
  0x1f   :  { %436 = vsyncadd [#allocation6], 4294965248  ;;  %v445_v0 = vmov 0.0   ;;  %vm446_vm0 = vmmov 0   ;;  %v62_v1 = vld [vmem:[#allocation5 + $0x78] sm:$0xff]  ;;  %v61_v2 = vld [vmem:[#allocation5 + $0x70] sm:$0xff] }
  0x20   :  { %290 = vmatprep.subr.mxu0 %v445_v0  ;;  %322 = vmatprep.mubr.msk.f32.mxu0 %vm446_vm0, %v445_v0  ;;  %v60_v3 = vld [vmem:[#allocation5 + $0x68] sm:$0xff]  ;;  %v59_v4 = vld [vmem:[#allocation5 + $0x60] sm:$0xff]  ;;  %v58_v5 = vld [vmem:[#allocation5 + $0x58] sm:$0xff] }
  0x21   :  { %325 = vmatprep.subr.mxu1 %v445_v0  ;;  %357 = vmatprep.mubr.msk.f32.mxu1 %vm446_vm0, %v445_v0  ;;  %v57_v6 = vld [vmem:[#allocation5 + $0x50] sm:$0xff]  ;;  %v56_v7 = vld [vmem:[#allocation5 + $0x48] sm:$0xff]  ;;  %v55_v8 = vld [vmem:[#allocation5 + $0x40] sm:$0xff] }
  0x22   :  { %291 = vmatpush3.msra.mxu0 %v62_v1  ;;  %326 = vmatpush3.msra.mxu1 %v62_v1  ;;  %v54_v9 = vld [vmem:[#allocation5 + $0x38] sm:$0xff]  ;;  %v53_v10 = vld [vmem:[#allocation5 + $0x30] sm:$0xff]  ;;  %v52_v11 = vld [vmem:[#allocation5 + $0x28] sm:$0xff] }
  0x23   :  { %292 = vmatprep.subr.mxu0 %v445_v0  ;;  %327 = vmatprep.subr.mxu1 %v445_v0  ;;  %v51_v12 = vld [vmem:[#allocation5 + $0x20] sm:$0xff]  ;;  %v50_v13 = vld [vmem:[#allocation5 + $0x18] sm:$0xff]  ;;  %v49_v14 = vld [vmem:[#allocation5 + $0x10] sm:$0xff] }
  0x24   :  { %293 = vmatpush3.msra.mxu0 %v61_v2  ;;  %328 = vmatpush3.msra.mxu1 %v61_v2  ;;  %v48_v15 = vld [vmem:[#allocation5 + $0x8] sm:$0xff]  ;;  %v47_v16 = vld [vmem:[#allocation5] sm:$0xff]  ;;  %v46_v17 = vld [vmem:[#allocation2] sm:$0xff] }
  0x25   :  { %294 = vmatprep.subr.mxu0 %v445_v0  ;;  %329 = vmatprep.subr.mxu1 %v445_v0  ;;  %v254_v32 = vld [vmem:[%s529_s1] ss:$0 sm:$0xff] }
  0x26   :  { %295 = vmatpush3.msra.mxu0 %v60_v3  ;;  %330 = vmatpush3.msra.mxu1 %v60_v3  ;;  %v255_v35 = vld [vmem:[%s530_s2] ss:$0 sm:$0xff] }
  0x27   :  { %296 = vmatprep.subr.mxu0 %v445_v0  ;;  %331 = vmatprep.subr.mxu1 %v445_v0 }
  0x28   :  { %297 = vmatpush3.msra.mxu0 %v59_v4  ;;  %332 = vmatpush3.msra.mxu1 %v59_v4 }
  0x29   :  { %298 = vmatprep.subr.mxu0 %v445_v0  ;;  %333 = vmatprep.subr.mxu1 %v445_v0 }
  0x2a   :  { %299 = vmatpush3.msra.mxu0 %v58_v5  ;;  %334 = vmatpush3.msra.mxu1 %v58_v5 }
  0x2b   :  { %300 = vmatprep.subr.mxu0 %v445_v0  ;;  %335 = vmatprep.subr.mxu1 %v445_v0 }
  0x2c   :  { %301 = vmatpush3.msra.mxu0 %v57_v6  ;;  %336 = vmatpush3.msra.mxu1 %v57_v6 }
  0x2d   :  { %302 = vmatprep.subr.mxu0 %v445_v0  ;;  %337 = vmatprep.subr.mxu1 %v445_v0 }
  0x2e   :  { %303 = vmatpush3.msra.mxu0 %v56_v7  ;;  %338 = vmatpush3.msra.mxu1 %v56_v7 }
  0x2f   :  { %304 = vmatprep.subr.mxu0 %v445_v0  ;;  %339 = vmatprep.subr.mxu1 %v445_v0 }
  0x30   :  { %305 = vmatpush3.msra.mxu0 %v55_v8  ;;  %340 = vmatpush3.msra.mxu1 %v55_v8 }
  0x31   :  { %306 = vmatprep.subr.mxu0 %v445_v0  ;;  %341 = vmatprep.subr.mxu1 %v445_v0 }
  0x32   :  { %307 = vmatpush3.msra.mxu0 %v54_v9  ;;  %342 = vmatpush3.msra.mxu1 %v54_v9 }
  0x33   :  { %308 = vmatprep.subr.mxu0 %v445_v0  ;;  %343 = vmatprep.subr.mxu1 %v445_v0 }
  0x34   :  { %309 = vmatpush3.msra.mxu0 %v53_v10  ;;  %344 = vmatpush3.msra.mxu1 %v53_v10 }
  0x35   :  { %310 = vmatprep.subr.mxu0 %v445_v0  ;;  %345 = vmatprep.subr.mxu1 %v445_v0 }
  0x36   :  { %311 = vmatpush3.msra.mxu0 %v52_v11  ;;  %346 = vmatpush3.msra.mxu1 %v52_v11 }
  0x37   :  { %312 = vmatprep.subr.mxu0 %v445_v0  ;;  %347 = vmatprep.subr.mxu1 %v445_v0 }
  0x38   :  { %313 = vmatpush3.msra.mxu0 %v51_v12  ;;  %348 = vmatpush3.msra.mxu1 %v51_v12 }
  0x39   :  { %314 = vmatprep.subr.mxu0 %v445_v0  ;;  %349 = vmatprep.subr.mxu1 %v445_v0 }
  0x3a   :  { %315 = vmatpush3.msra.mxu0 %v50_v13  ;;  %350 = vmatpush3.msra.mxu1 %v50_v13 }
  0x3b   :  { %316 = vmatprep.subr.mxu0 %v445_v0  ;;  %351 = vmatprep.subr.mxu1 %v445_v0 }
  0x3c   :  { %317 = vmatpush3.msra.mxu0 %v49_v14  ;;  %352 = vmatpush3.msra.mxu1 %v49_v14 }
  0x3d   :  { %318 = vmatprep.subr.mxu0 %v445_v0  ;;  %353 = vmatprep.subr.mxu1 %v445_v0 }
  0x3e   :  { %319 = vmatpush3.msra.mxu0 %v48_v15  ;;  %354 = vmatpush3.msra.mxu1 %v48_v15 }
  0x3f   :  { %320 = vmatprep.subr.mxu0 %v445_v0  ;;  %355 = vmatprep.subr.mxu1 %v445_v0 }
  0x40   :  { %321 = vmatpush3.msra.mxu0 %v47_v16  ;;  %356 = vmatpush3.msra.mxu1 %v47_v16 }
  0x41   :  { %323 = vmatmul.mubr.f32.vlgmr.msra.gmra.mxu0 %v46_v17 }
 0x101   :  { %v129_v18 = vpop.f32.mrf.mxu0 }
 0x102   :  { %v133_v19 = vmul.f32 0.03125, %v129_v18 }
 0x103   :  { %v324_v20 = vpop.f32.mrf.mxu0 }
 0x104   :  { %v134_v21 = vsub.f32 %v46_v17, %v133_v19 }
 0x106   :  { %v135_v22 = vmul.f32 %v134_v21, %v134_v21 }
 0x108   :  { %358 = vmatmul.mubr.f32.vlgmr.msra.gmra.mxu1 %v135_v22 }
 0x1c8   :  { %v202_v23 = vpop.f32.mrf.mxu1 }
 0x1c9   :  { %v206_v24 = vmul.f32 0.032258064, %v202_v23 }
 0x1ca   :  { %v359_v25 = vpop.f32.mrf.mxu1 }
 0x1cb   :  { %369 = vrsqrt.f32 %v206_v24  ;;  %vm209_vm1 = vcmp.eq.f32.partialorder %v206_v24, inf  ;;  %v212_v28 = vand.u32 2147483648, %v206_v24  ;;  %vm211_vm2 = vcmp.eq.f32.partialorder %v206_v24, 0.0 }
 0x1d8   :  { %v370_v26 = vpop.eup %369 }
 0x1d9   :  { %v208_v27 = vmul.f32 %v370_v26, %v206_v24 }
 0x1db   :  { %v210_v29 = vsel %vm209_vm1, %v206_v24, %v208_v27 }
 0x1dc   :  { %v213_v30 = vsel %vm211_vm2, %v212_v28, %v210_v29 }
 0x1dd   :  { %v214_v31 = vadd.f32 1e-06, %v213_v30 }
 0x1df   :  { %371 = vrcp.f32 %v214_v31 }
 0x1ec   :  { %v372_v33 = vpop.eup %371 }
 0x1ed   :  { %v223_v34 = vmul.f32 %v372_v33, %v254_v32 }
 0x1ef   :  { %v225_v36 = vmul.f32 %v223_v34, %v133_v19  ;;  %v233_v38 = vmul.f32 %v223_v34, %v46_v17 }
 0x1f1   :  { %v232_v37 = vsub.f32 %v255_v35, %v225_v36 }
 0x1f3   :  { %v234_v39 = vadd.f32 %v233_v38, %v232_v37 }
 0x1f5   :  { %235 = vst [vmem:[#allocation7] sm:$0xff] %v234_v39 }
 0x1f6   :  { %240 = vsyncadd [#allocation4], 64  ;;  %s447_s6 = smov [#allocation7]  }
 0x1f7   :  { %s241_s7 = sshll.u32 %s447_s6, 4  ;;  %s242_s7 = int_to_ptr.vmem [resolvable:$true] %s241_s7 }
 0x1f8   :  { %s413_s8 = scalar_lea.vmem %s242_s7, 64  ;;  %s417_s9 = scalar_lea.vmem %s242_s7, 128 }
 0x1f9   :  { %p414_p10 = scmp.ne.s32.totalorder %s242_s7, %s413_s8  ;;  %p418_p11 = scmp.lt.s32.totalorder %s242_s7, %s242_s7 }
 0x1fa   :  { %p419_p12 = scmp.lt.s32.totalorder %s417_s9, %s413_s8 }
 0x1fc   :  { %p420_p13 = por %p419_p12, %p418_p11 }
 0x1fe   :  { %p421_p0 = pnand %p420_p13, %p414_p10 }
 0x200   :  { %424 = shalt.err (!%p421_p0)
}
 0x201   :  { %247 = dma.vmem_to_hbm [thread:$0]  %s242_s7, 64, %s532_s4, [#allocation4], %s440_s19, %s440_s19, %s441_s20  }
 0x202   :  { %437 = dma.done.wait [#allocation4], 128  }
 0x203   :  { %438 = vsyncadd [#allocation4], 4294967168 }
 0x204   :  { %251 = vsyncpa [#allocation3], 1 }
 0x205   :  { %252 = vsyncpa [#allocation6], 1 }
 0x206   :  { %253 = vsyncpa [#allocation4], 1 }

</bundles_post_ra>
